<compile_context>
chip_gen: v7x
topology: tpu7x:2x2x1
jax: 0.10.0
libtpu: 0.0.40
codegen_flags: <defaults>
</compile_context>

<pallas_src>
import math
from typing import NamedTuple

import jax
import jax.numpy as jnp
from jax.experimental import pallas as pl
from jax.experimental.pallas import tpu as pltpu

_LANE = 128


def _round_up(x, m):
    return (x + m - 1) // m * m


class CPPParams(NamedTuple):
    """Kernel-ready parameters: weights [in, out] (lane-padded, compute dtype),
    biases [1, out] (lane-padded, f32), plus the true attr width."""
    w1: jax.Array
    b1: jax.Array
    w2: jax.Array
    b2: jax.Array
    w3: jax.Array
    b3: jax.Array
    attr_num: int


def prepare_params(params, *, compute_dtype=jnp.bfloat16):
    """One-time parameter preparation (do NOT call per forward pass).

    Casts weights to `compute_dtype` (bf16 default: the MXU is bf16-native on
    v5e/v6e/v7x; accumulation / bias / activation stay f32 in-kernel) and
    zero-pads H1, H2 and attr_num up to multiples of 128 lanes. Exact.
    """
    w1, b1, w2, b2, w3, b3 = params
    w1, w2, w3 = (jnp.asarray(w) for w in (w1, w2, w3))
    b1, b2, b3 = (jnp.asarray(b).reshape(1, -1).astype(jnp.float32)
                  for b in (b1, b2, b3))
    D, H1 = w1.shape
    H2 = w2.shape[1]
    A = w3.shape[1]
    H1p, H2p, Ap = (_round_up(n, _LANE) for n in (H1, H2, A))

    def pad_w(w, rows, cols):
        w = w.astype(jnp.float32)
        w = jnp.pad(w, ((0, rows - w.shape[0]), (0, cols - w.shape[1])))
        return w.astype(compute_dtype)

    def pad_b(b, cols):
        return jnp.pad(b, ((0, 0), (0, cols - b.shape[1])))

    return CPPParams(
        w1=pad_w(w1, D, H1p), b1=pad_b(b1, H1p),
        w2=pad_w(w2, H1p, H2p), b2=pad_b(b2, H2p),
        w3=pad_w(w3, H2p, Ap), b3=pad_b(b3, Ap),
        attr_num=A,
    )


def _make_kernel(activation):
    if activation == "gelu":
        # TODO(synk): PyTorch nn.GELU() defaults to the exact erf form; the
        # tanh approximation is used here for guaranteed Mosaic lowering.
        act = lambda v: jax.nn.gelu(v, approximate=True)
    elif activation == "relu":
        act = lambda v: jnp.maximum(v, 0.0)
    else:
        raise ValueError(f"unsupported activation: {activation}")

    def kernel(x_ref, w1_ref, b1_ref, w2_ref, b2_ref, w3_ref, b3_ref, o_ref):
        # fc1 + act: cast x to the MXU compute dtype in-kernel, f32 accumulate.
        h = jnp.dot(x_ref[...].astype(w1_ref.dtype), w1_ref[...],
                    preferred_element_type=jnp.float32)
        h = act(h + b1_ref[...])
        # fc2 + act
        h = jnp.dot(h.astype(w2_ref.dtype), w2_ref[...],
                    preferred_element_type=jnp.float32)
        h = act(h + b2_ref[...])
        # fc3 (no activation)
        out = jnp.dot(h.astype(w3_ref.dtype), w3_ref[...],
                      preferred_element_type=jnp.float32) + b3_ref[...]
        o_ref[...] = out.astype(o_ref.dtype)

    return kernel


def cpp_forward(x, params: CPPParams, *, activation="relu", max_tile_m=256,
                weight_buffers=None, trim_output=True):
    """Pallas implementation of CPP.forward.

    x: [B, v_embedding].  params: output of prepare_params().
    weight_buffers: None -> compiler default; 1 -> single-buffer the
      grid-invariant weight/bias blocks (halves their VMEM footprint; validate
      pl.Buffered(1) support on your Mosaic version before enabling).
    trim_output: False returns the padded (B_pad, A_pad) buffer (no slice copy).
    """
    w1, b1, w2, b2, w3, b3, attr_num = params
    B, D = x.shape
    if w1.shape[0] != D:
        raise ValueError(f"x feature dim {D} != fc1 in_features {w1.shape[0]}")
    H1p, H2p, Ap = w1.shape[1], w2.shape[1], w3.shape[1]
    out_dtype = x.dtype

    # Balanced batch tiling: minimal padding; >=2 "parallel" steps for B > 256
    # so v7x megacore can shard the batch (v5e/v6e: negligible extra overhead).
    sub_min = 8  # activations / output are f32 -> 8-row sublane granularity
    num_tiles = max(int(pl.cdiv(B, max_tile_m)), 1)
    tile_m = _round_up(int(pl.cdiv(B, num_tiles)), sub_min)
    B_pad = tile_m * num_tiles
    if B_pad != B:
        x = jnp.pad(x, ((0, B_pad - B), (0, 0)))

    # Grid-invariant weight/bias blocks (index map constant across the grid).
    if weight_buffers is None:
        def const_spec(shape):
            return pl.BlockSpec(shape, lambda i: (0, 0))
        wbuf = 2
    else:
        def const_spec(shape):
            return pl.BlockSpec(shape, lambda i: (0, 0),
                                pipeline_mode=pl.Buffered(weight_buffers))
        wbuf = weight_buffers

    # Explicit VMEM budget from the resident buffers (+headroom, 32 MiB floor)
    # instead of the default scoped limit (16 MiB v5e / 32 MiB v6e,v7x).
    wbytes = sum(int(a.size) * a.dtype.itemsize
                 for a in (w1, b1, w2, b2, w3, b3))
    resident = (wbuf * wbytes
                + 2 * tile_m * D * x.dtype.itemsize          # x tile (dbl buf)
                + 2 * tile_m * Ap * jnp.dtype(out_dtype).itemsize  # out tile
                + tile_m * (H1p + H2p) * 6)                   # f32 + bf16 temps
    vmem_limit = int(min(max(resident + resident // 2 + (8 << 20), 32 << 20),
                         64 << 20))
    # TODO(synk): if bf16 weights alone exceed ~48 MiB (large v_embedding on
    # v7x's 64 MiB VMEM), add a K-tiled (contraction-split) path for W1 with an
    # f32 accumulator instead of keeping all weights resident.

    flops = 2 * B_pad * (D * H1p + H1p * H2p + H2p * Ap)
    transcendentals = B_pad * (H1p + H2p) if activation == "gelu" else 0
    bytes_accessed = (wbytes
                      + B_pad * D * x.dtype.itemsize
                      + B_pad * Ap * jnp.dtype(out_dtype).itemsize)

    out = pl.pallas_call(
        _make_kernel(activation),
        out_shape=jax.ShapeDtypeStruct((B_pad, Ap), out_dtype),
        grid_spec=pltpu.PrefetchScalarGridSpec(
            num_scalar_prefetch=0,
            grid=(num_tiles,),
            in_specs=[
                pl.BlockSpec((tile_m, D), lambda i: (i, 0)),  # x tile
                const_spec((D, H1p)),                         # W1
                const_spec((1, H1p)),                         # b1
                const_spec((H1p, H2p)),                       # W2
                const_spec((1, H2p)),                         # b2
                const_spec((H2p, Ap)),                        # W3 (lane-padded)
                const_spec((1, Ap)),                          # b3 (lane-padded)
            ],
            out_specs=pl.BlockSpec((tile_m, Ap), lambda i: (i, 0)),
        ),
        compiler_params=pltpu.CompilerParams(
            dimension_semantics=("parallel",),
            vmem_limit_bytes=vmem_limit,
        ),
        cost_estimate=pl.CostEstimate(
            flops=flops, transcendentals=transcendentals,
            bytes_accessed=bytes_accessed),
    )(x, w1, b1, w2, b2, w3, b3)

    if trim_output:
        out = out[:B, :attr_num]
    return out


def init_linear(key, fan_in, fan_out, dtype=jnp.float32):
    """nn.Linear-style init (uniform +-1/sqrt(fan_in)); weight as [in, out]."""
    k_w, k_b = jax.random.split(key)
    bound = 1.0 / math.sqrt(fan_in)
    w = jax.random.uniform(k_w, (fan_in, fan_out), dtype, -bound, bound)
    b = jax.random.uniform(k_b, (1, fan_out), dtype, -bound, bound)
    return w, b


if __name__ == "__main__":
    # Module hyperparameters (small, self-consistent shapes).
    v_embedding = 128
    attr_num = 8
    batch = 16

    key = jax.random.PRNGKey(0)
    kx, k1, k2, k3 = jax.random.split(key, 4)

    x = jax.random.normal(kx, (batch, v_embedding), jnp.float32)

    w1, b1 = init_linear(k1, v_embedding, v_embedding // 2)       # fc1
    w2, b2 = init_linear(k2, v_embedding // 2, v_embedding // 4)  # fc2
    w3, b3 = init_linear(k3, v_embedding // 4, attr_num)          # fc3
    raw_params = (w1, b1, w2, b2, w3, b3)

    def ref_fwd(xr, act=lambda v: jnp.maximum(v, 0.0)):
        h = act(xr @ w1 + b1)
        h = act(h @ w2 + b2)
        return h @ w3 + b3

    # One-time parameter preparation (no per-call weight cast/pad traffic).
    prep_bf16 = prepare_params(raw_params)                          # bf16 MXU
    prep_f32 = prepare_params(raw_params, compute_dtype=jnp.float32)

    # 1) default path: bf16 MXU operands, single batch tile, jitted usage.
    fwd = jax.jit(lambda xb: cpp_forward(xb, prep_bf16))
    out = jax.block_until_ready(fwd(x))
    assert out.shape == (batch, attr_num)
    assert jnp.allclose(out, ref_fwd(x), atol=5e-2, rtol=5e-2)

    # 2) odd batch -> wrapper pads rows to the sublane multiple, slices back.
    x_odd = x[:13]
    out_odd = jax.block_until_ready(cpp_forward(x_odd, prep_bf16))
    assert out_odd.shape == (13, attr_num)
    assert jnp.allclose(out_odd, ref_fwd(x_odd), atol=5e-2, rtol=5e-2)

    # 3) batch > max_tile_m -> balanced 2-step "parallel" grid (v7x megacore).
    x_big = jax.random.normal(jax.random.PRNGKey(1), (300, v_embedding),
                              jnp.float32)
    out_big = jax.block_until_ready(cpp_forward(x_big, prep_bf16))
    assert out_big.shape == (300, attr_num)
    assert jnp.allclose(out_big, ref_fwd(x_big), atol=5e-2, rtol=5e-2)

    # 4) f32 MXU path (tight numerics).
    out_f32 = jax.block_until_ready(cpp_forward(x, prep_f32))
    assert out_f32.shape == (batch, attr_num)
    assert jnp.allclose(out_f32, ref_fwd(x), atol=1e-5, rtol=1e-5)

    # 5) GELU activation variant (tanh approximation in-kernel).
    gelu = lambda v: jax.nn.gelu(v, approximate=True)
    out_gelu = jax.block_until_ready(
        cpp_forward(x, prep_bf16, activation="gelu"))
    assert jnp.allclose(out_gelu, ref_fwd(x, act=gelu), atol=5e-2, rtol=5e-2)

    print("KERNEL_OK")
</pallas_src>

<mosaic_0001>
module attributes {stable_mosaic.version = 11 : i64} {
  func.func @kernel(%arg0: i32, %arg1: memref<16x128xf32, #tpu.memory_space<vmem>>, %arg2: memref<128x128xbf16, #tpu.memory_space<vmem>>, %arg3: memref<1x128xf32, #tpu.memory_space<vmem>>, %arg4: memref<128x128xbf16, #tpu.memory_space<vmem>>, %arg5: memref<1x128xf32, #tpu.memory_space<vmem>>, %arg6: memref<128x128xbf16, #tpu.memory_space<vmem>>, %arg7: memref<1x128xf32, #tpu.memory_space<vmem>>, %arg8: memref<16x128xf32, #tpu.memory_space<vmem>>) attributes {dimension_semantics = [#tpu.dimension_semantics<parallel>], iteration_bounds = array<i64: 1>, scalar_prefetch = 0 : i64, scratch_operands = 0 : i64, tpu.core_type = #tpu.core_type<tc>, window_params = [{transform_indices = @transform_0, window_bounds = array<i64: 16, 128>}, {pipeline_mode = #tpu.pipeline_mode<synchronous>, transform_indices = @transform_1, window_bounds = array<i64: 128, 128>}, {pipeline_mode = #tpu.pipeline_mode<synchronous>, transform_indices = @transform_2, window_bounds = array<i64: 1, 128>}, {pipeline_mode = #tpu.pipeline_mode<synchronous>, transform_indices = @transform_3, window_bounds = array<i64: 128, 128>}, {pipeline_mode = #tpu.pipeline_mode<synchronous>, transform_indices = @transform_4, window_bounds = array<i64: 1, 128>}, {pipeline_mode = #tpu.pipeline_mode<synchronous>, transform_indices = @transform_5, window_bounds = array<i64: 128, 128>}, {pipeline_mode = #tpu.pipeline_mode<synchronous>, transform_indices = @transform_6, window_bounds = array<i64: 1, 128>}, {transform_indices = @transform_7, window_bounds = array<i64: 16, 128>}]} {
    %c0 = arith.constant 0 : index
    %c0_0 = arith.constant 0 : index
    %0 = vector.load %arg1[%c0, %c0_0] : memref<16x128xf32, #tpu.memory_space<vmem>>, vector<16x128xf32>
    %1 = arith.truncf %0 : vector<16x128xf32> to vector<16x128xbf16>
    %c0_1 = arith.constant 0 : index
    %c0_2 = arith.constant 0 : index
    %2 = vector.load %arg2[%c0_1, %c0_2] : memref<128x128xbf16, #tpu.memory_space<vmem>>, vector<128x128xbf16>
    %cst = arith.constant dense<0.000000e+00> : vector<16x128xf32>
    %3 = tpu.matmul %1, %2, %cst {dimension_numbers = #tpu.dot_dimension_numbers<[1], [0], [0], [1], [0, 0, 1, 1], [], []>} : vector<16x128xbf16>, vector<128x128xbf16>, vector<16x128xf32> -> vector<16x128xf32>
    %c0_3 = arith.constant 0 : index
    %c0_4 = arith.constant 0 : index
    %4 = vector.load %arg3[%c0_3, %c0_4] : memref<1x128xf32, #tpu.memory_space<vmem>>, vector<1x128xf32>
    %5 = vector.broadcast %4 : vector<1x128xf32> to vector<16x128xf32>
    %6 = arith.addf %3, %5 : vector<16x128xf32>
    %cst_5 = arith.constant 0.000000e+00 : f32
    %7 = vector.broadcast %cst_5 : f32 to vector<16x128xf32>
    %8 = arith.maximumf %6, %7 : vector<16x128xf32>
    %9 = arith.truncf %8 : vector<16x128xf32> to vector<16x128xbf16>
    %c0_6 = arith.constant 0 : index
    %c0_7 = arith.constant 0 : index
    %10 = vector.load %arg4[%c0_6, %c0_7] : memref<128x128xbf16, #tpu.memory_space<vmem>>, vector<128x128xbf16>
    %cst_8 = arith.constant dense<0.000000e+00> : vector<16x128xf32>
    %11 = tpu.matmul %9, %10, %cst_8 {dimension_numbers = #tpu.dot_dimension_numbers<[1], [0], [0], [1], [0, 0, 1, 1], [], []>} : vector<16x128xbf16>, vector<128x128xbf16>, vector<16x128xf32> -> vector<16x128xf32>
    %c0_9 = arith.constant 0 : index
    %c0_10 = arith.constant 0 : index
    %12 = vector.load %arg5[%c0_9, %c0_10] : memref<1x128xf32, #tpu.memory_space<vmem>>, vector<1x128xf32>
    %13 = vector.broadcast %12 : vector<1x128xf32> to vector<16x128xf32>
    %14 = arith.addf %11, %13 : vector<16x128xf32>
    %cst_11 = arith.constant 0.000000e+00 : f32
    %15 = vector.broadcast %cst_11 : f32 to vector<16x128xf32>
    %16 = arith.maximumf %14, %15 : vector<16x128xf32>
    %17 = arith.truncf %16 : vector<16x128xf32> to vector<16x128xbf16>
    %c0_12 = arith.constant 0 : index
    %c0_13 = arith.constant 0 : index
    %18 = vector.load %arg6[%c0_12, %c0_13] : memref<128x128xbf16, #tpu.memory_space<vmem>>, vector<128x128xbf16>
    %cst_14 = arith.constant dense<0.000000e+00> : vector<16x128xf32>
    %19 = tpu.matmul %17, %18, %cst_14 {dimension_numbers = #tpu.dot_dimension_numbers<[1], [0], [0], [1], [0, 0, 1, 1], [], []>} : vector<16x128xbf16>, vector<128x128xbf16>, vector<16x128xf32> -> vector<16x128xf32>
    %c0_15 = arith.constant 0 : index
    %c0_16 = arith.constant 0 : index
    %20 = vector.load %arg7[%c0_15, %c0_16] : memref<1x128xf32, #tpu.memory_space<vmem>>, vector<1x128xf32>
    %21 = vector.broadcast %20 : vector<1x128xf32> to vector<16x128xf32>
    %22 = arith.addf %19, %21 : vector<16x128xf32>
    %c0_17 = arith.constant 0 : index
    %c0_18 = arith.constant 0 : index
    %23 = vector.load %arg8[%c0_17, %c0_18] : memref<16x128xf32, #tpu.memory_space<vmem>>, vector<16x128xf32>
    tpu.vector_store %arg8[%c0_17, %c0_18], %22 {strides = array<i32>} : memref<16x128xf32, #tpu.memory_space<vmem>>, vector<16x128xf32>,
    return
  }
  func.func @transform_0(%arg0: i32) -> (i32, i32) {
    %c0_i32 = arith.constant 0 : i32
    %c0_i32_0 = arith.constant 0 : i32
    return %arg0, %c0_i32 : i32, i32
  }
  func.func @transform_1(%arg0: i32) -> (i32, i32) {
    %c0_i32 = arith.constant 0 : i32
    %c0_i32_0 = arith.constant 0 : i32
    %c0_i32_1 = arith.constant 0 : i32
    return %c0_i32, %c0_i32_0 : i32, i32
  }
  func.func @transform_2(%arg0: i32) -> (i32, i32) {
    %c0_i32 = arith.constant 0 : i32
    %c0_i32_0 = arith.constant 0 : i32
    %c0_i32_1 = arith.constant 0 : i32
    return %c0_i32, %c0_i32_0 : i32, i32
  }
  func.func @transform_3(%arg0: i32) -> (i32, i32) {
    %c0_i32 = arith.constant 0 : i32
    %c0_i32_0 = arith.constant 0 : i32
    %c0_i32_1 = arith.constant 0 : i32
    return %c0_i32, %c0_i32_0 : i32, i32
  }
  func.func @transform_4(%arg0: i32) -> (i32, i32) {
    %c0_i32 = arith.constant 0 : i32
    %c0_i32_0 = arith.constant 0 : i32
    %c0_i32_1 = arith.constant 0 : i32
    return %c0_i32, %c0_i32_0 : i32, i32
  }
  func.func @transform_5(%arg0: i32) -> (i32, i32) {
    %c0_i32 = arith.constant 0 : i32
    %c0_i32_0 = arith.constant 0 : i32
    %c0_i32_1 = arith.constant 0 : i32
    return %c0_i32, %c0_i32_0 : i32, i32
  }
  func.func @transform_6(%arg0: i32) -> (i32, i32) {
    %c0_i32 = arith.constant 0 : i32
    %c0_i32_0 = arith.constant 0 : i32
    %c0_i32_1 = arith.constant 0 : i32
    return %c0_i32, %c0_i32_0 : i32, i32
  }
  func.func @transform_7(%arg0: i32) -> (i32, i32) {
    %c0_i32 = arith.constant 0 : i32
    %c0_i32_0 = arith.constant 0 : i32
    return %arg0, %c0_i32 : i32, i32
  }
}

</mosaic_0001>

<bundles_post_ra>
// kernel: _lambda_.1
= control target key start
LH: loop header
LB: loop body
LE: loop exit
PB: predicated region body
PF: predicated region fallthrough
CT: control target
= control target key end

     0   :  { %12 = vsyncpa [#allocation3], 0  ;;  %s837_s0 = inlined_call_operand.hbm [shape: f32[16,128], index: 0, kind: input, shape index: {}]   ;;  %s838_s1 = inlined_call_operand.hbm [shape: bf16[128,128], index: 1, kind: input, shape index: {}]   ;;  %s839_s2 = inlined_call_operand.vmem [shape: f32[1,128], index: 2, kind: input, shape index: {}]   ;;  %s840_s3 = inlined_call_operand.hbm [shape: bf16[128,128], index: 3, kind: input, shape index: {}]   ;;  %s841_s4 = inlined_call_operand.vmem [shape: f32[1,128], index: 4, kind: input, shape index: {}]   ;;  %s842_s5 = inlined_call_operand.hbm [shape: bf16[128,128], index: 5, kind: input, shape index: {}]   ;;  %s843_s6 = inlined_call_operand.vmem [shape: f32[1,128], index: 6, kind: input, shape index: {}]   ;;  %s844_s7 = inlined_call_operand.vmem [shape: f32[16,128], index: 7, kind: output, shape index: {}]  }
   0x1   :  { %13 = vsyncpa [#allocation5], 0 }
   0x2   :  { %14 = vsyncpa [#allocation8], 0  ;;  %s678_s24 = smov [#allocation4]   ;;  %s584_s28 = scalar_lea.hbm %s838_s1, 1024 }
   0x3   :  { %s32_s25 = sshll.u32 %s678_s24, 4  ;;  %p585_p0 = scmp.ne.s32.totalorder %s838_s1, %s584_s28  ;;  %s33_s25 = int_to_ptr.vmem [resolvable:$true] %s32_s25 }
   0x4   :  { %p588_p1 = scmp.lt.u32.totalorder %s584_s28, %s838_s1 }
   0x6   :  { %p590_p2 = pnand %p588_p1, %p585_p0 }
   0x8   :  { %593 = shalt.err (!%p590_p2)
}
   0x9   :  { %s594_s10 = scalar_lea.vmem %s33_s25, 1024  ;;  %p599_p4 = scmp.lt.s32.totalorder %s33_s25, %s33_s25 }
   0xa   :  { %p595_p3 = scmp.ne.s32.totalorder %s33_s25, %s594_s10  ;;  %p600_p5 = scmp.lt.s32.totalorder %s594_s10, %s594_s10 }
   0xc   :  { %p601_p6 = por %p600_p5, %p599_p4 }
   0xe   :  { %p602_p7 = pnand %p601_p6, %p595_p3 }
  0x10   :  { %605 = shalt.err (!%p602_p7)
}
  0x11   :  { %s679_s11 = smov 64   ;;  %s680_s12 = smov 4  }
  0x12   :  { %38 = dma.hbm_to_vmem [thread:$0]  %s838_s1, 1024, %s33_s25, [#allocation5], %s679_s11, %s679_s11, %s680_s12  }
  0x13   :  { %s681_s15 = smov [#allocation2]   ;;  %s606_s19 = scalar_lea.hbm %s837_s0, 256 }
  0x14   :  { %s20_s16 = sshll.u32 %s681_s15, 4  ;;  %p607_p8 = scmp.ne.s32.totalorder %s837_s0, %s606_s19  ;;  %s21_s16 = int_to_ptr.vmem [resolvable:$true] %s20_s16 }
  0x15   :  { %p610_p9 = scmp.lt.u32.totalorder %s606_s19, %s837_s0 }
  0x17   :  { %p612_p10 = pnand %p610_p9, %p607_p8 }
  0x19   :  { %615 = shalt.err (!%p612_p10)
}
  0x1a   :  { %s616_s24 = scalar_lea.vmem %s21_s16, 256  ;;  %p621_p12 = scmp.lt.s32.totalorder %s21_s16, %s21_s16 }
  0x1b   :  { %p617_p11 = scmp.ne.s32.totalorder %s21_s16, %s616_s24  ;;  %p622_p13 = scmp.lt.s32.totalorder %s616_s24, %s616_s24 }
  0x1d   :  { %p623_p0 = por %p622_p13, %p621_p12 }
  0x1f   :  { %p624_p1 = pnand %p623_p0, %p617_p11 }
  0x21   :  { %627 = shalt.err (!%p624_p1)
}
  0x22   :  { %s682_s1 = smov 128   ;;  %s683_s25 = smov 8  }
  0x23   :  { %26 = dma.hbm_to_vmem [thread:$0]  %s837_s0, 256, %s21_s16, [#allocation3], %s682_s1, %s682_s1, %s683_s25  }
  0x24   :  { %s684_s28 = smov [#allocation6]   ;;  %s685_s30 = smov [#allocation7]  }
  0x25   :  { %s46_s29 = sshll.u32 %s684_s28, 4  ;;  %s60_s8 = sshll.u32 %s685_s30, 4  ;;  %s47_s29 = int_to_ptr.vmem [resolvable:$true] %s46_s29  ;;  %s755_s8 = int_to_ptr.vmem [resolvable:$true] %s60_s8 }
  0x26   :  { %s628_s13 = scalar_lea.hbm %s840_s3, 1024 }
  0x27   :  { %p629_p2 = scmp.ne.s32.totalorder %s840_s3, %s628_s13  ;;  %p632_p3 = scmp.lt.u32.totalorder %s628_s13, %s840_s3 }
  0x29   :  { %p634_p4 = pnand %p632_p3, %p629_p2 }
  0x2b   :  { %637 = shalt.err (!%p634_p4)
}
  0x2c   :  { %s638_s0 = scalar_lea.vmem %s47_s29, 1024  ;;  %p643_p6 = scmp.lt.s32.totalorder %s47_s29, %s47_s29 }
  0x2d   :  { %p639_p5 = scmp.ne.s32.totalorder %s47_s29, %s638_s0  ;;  %p644_p7 = scmp.lt.s32.totalorder %s638_s0, %s638_s0 }
  0x2f   :  { %p645_p8 = por %p644_p7, %p643_p6 }
  0x31   :  { %p646_p9 = pnand %p645_p8, %p639_p5 }
  0x33   :  { %649 = shalt.err (!%p646_p9)
}
  0x34   :  { %52 = dma.hbm_to_vmem [thread:$0]  %s840_s3, 1024, %s47_s29, [#allocation5], %s679_s11, %s679_s11, %s680_s12  }
  0x35   :  { %s650_s22 = scalar_lea.hbm %s842_s5, 1024 }
  0x36   :  { %p651_p10 = scmp.ne.s32.totalorder %s842_s5, %s650_s22  ;;  %p654_p11 = scmp.lt.u32.totalorder %s650_s22, %s842_s5 }
  0x38   :  { %p656_p12 = pnand %p654_p11, %p651_p10 }
  0x3a   :  { %659 = shalt.err (!%p656_p12)
}
  0x3b   :  { %s660_s26 = scalar_lea.vmem %s755_s8, 1024  ;;  %p665_p0 = scmp.lt.s32.totalorder %s755_s8, %s755_s8 }
  0x3c   :  { %p661_p13 = scmp.ne.s32.totalorder %s755_s8, %s660_s26  ;;  %p666_p1 = scmp.lt.s32.totalorder %s660_s26, %s660_s26 }
  0x3e   :  { %p667_p2 = por %p666_p1, %p665_p0 }
  0x40   :  { %p668_p3 = pnand %p667_p2, %p661_p13 }
  0x42   :  { %671 = shalt.err (!%p668_p3)
}
  0x43   :  { %66 = dma.hbm_to_vmem [thread:$0]  %s842_s5, 1024, %s755_s8, [#allocation8], %s679_s11, %s679_s11, %s680_s12  }
  0x44   :  { %672 = dma.done.wait [#allocation3], 256  }
  0x45   :  { %673 = vsyncadd [#allocation3], 4294967040 }
  0x46   :  { %674 = dma.done.wait [#allocation5], 2048  }
  0x47   :  { %675 = vsyncadd [#allocation5], 4294965248 }
  0x48   :  { %676 = dma.done.wait [#allocation8], 1024  }
  0x49   :  { %677 = vsyncadd [#allocation8], 4294966272  ;;  %v686_v0 = vmov 0.0   ;;  %vm687_vm0 = vmmov 0   ;;  %v560_v1 = vld [vmem:[#allocation4] sm:$0xff]   ;;  %v561_v2 = vld [vmem:[#allocation4 + $0x8] sm:$0xff]  }
  0x4a   :  { %490 = vmatprep.subr.bf16.mxu0 %v686_v0  ;;  %506 = vmatprep.mubr.msk.bf16.mxu0 %vm687_vm0, %v686_v0  ;;  %v562_v3 = vld [vmem:[#allocation4 + $0x10] sm:$0xff]   ;;  %v568_v4 = vld [vmem:[#allocation6] sm:$0xff]   ;;  %v563_v5 = vld [vmem:[#allocation4 + $0x18] sm:$0xff]  }
  0x4b   :  { %510 = vmatprep.subr.bf16.mxu1 %v686_v0  ;;  %526 = vmatprep.mubr.msk.bf16.mxu1 %vm687_vm0, %v686_v0  ;;  %v569_v6 = vld [vmem:[#allocation6 + $0x8] sm:$0xff]   ;;  %v564_v7 = vld [vmem:[#allocation4 + $0x20] sm:$0xff]   ;;  %v570_v8 = vld [vmem:[#allocation6 + $0x10] sm:$0xff]  }
  0x4c   :  { %491 = vmatpush3.bf16.msra.mxu0 %v560_v1  ;;  %511 = vmatpush3.bf16.msra.mxu1 %v568_v4  ;;  %v565_v9 = vld [vmem:[#allocation4 + $0x28] sm:$0xff]   ;;  %v571_v10 = vld [vmem:[#allocation6 + $0x18] sm:$0xff]   ;;  %v566_v11 = vld [vmem:[#allocation4 + $0x30] sm:$0xff]  }
  0x4d   :  { %492 = vmatprep.subr.bf16.mxu0 %v686_v0  ;;  %512 = vmatprep.subr.bf16.mxu1 %v686_v0  ;;  %v572_v12 = vld [vmem:[#allocation6 + $0x20] sm:$0xff]   ;;  %v567_v13 = vld [vmem:[#allocation4 + $0x38] sm:$0xff]   ;;  %v82_v14 = vld [vmem:[#allocation2] sm:$0xff] }
  0x4e   :  { %v83_v15 = vld [vmem:[#allocation2 + $0x8] sm:$0xff]  ;;  %v573_v16 = vld [vmem:[#allocation6 + $0x28] sm:$0xff]   ;;  %v574_v18 = vld [vmem:[#allocation6 + $0x30] sm:$0xff]  }
  0x4f   :  { %v84_v17 = vpack.c.bf16 %v83_v15, %v82_v14  ;;  %v575_v19 = vld [vmem:[#allocation6 + $0x38] sm:$0xff]   ;;  %v576_v20 = vld [vmem:[#allocation7] sm:$0xff]   ;;  %v577_v21 = vld [vmem:[#allocation7 + $0x8] sm:$0xff]  }
  0x50   :  { %493 = vmatpush3.bf16.msra.mxu0 %v561_v2  ;;  %513 = vmatpush3.bf16.msra.mxu1 %v569_v6  ;;  %v578_v22 = vld [vmem:[#allocation7 + $0x10] sm:$0xff]   ;;  %v579_v23 = vld [vmem:[#allocation7 + $0x18] sm:$0xff]   ;;  %v580_v24 = vld [vmem:[#allocation7 + $0x20] sm:$0xff]  }
  0x51   :  { %494 = vmatprep.subr.bf16.mxu0 %v686_v0  ;;  %514 = vmatprep.subr.bf16.mxu1 %v686_v0  ;;  %v581_v25 = vld [vmem:[#allocation7 + $0x28] sm:$0xff]   ;;  %v436_v26 = vld [vmem:[%s839_s2] ss:$0 sm:$0xff]  ;;  %v583_v37 = vld [vmem:[#allocation7 + $0x38] sm:$0xff]  }
  0x52   :  { %v582_v36 = vld [vmem:[#allocation7 + $0x30] sm:$0xff]  }
  0x53   :  { %v445_v38 = vld [vmem:[%s841_s4] ss:$0 sm:$0xff] }
  0x54   :  { %495 = vmatpush3.bf16.msra.mxu0 %v562_v3  ;;  %515 = vmatpush3.bf16.msra.mxu1 %v570_v8  ;;  %v454_v48 = vld [vmem:[%s843_s6] ss:$0 sm:$0xff] }
  0x55   :  { %496 = vmatprep.subr.bf16.mxu0 %v686_v0  ;;  %516 = vmatprep.subr.bf16.mxu1 %v686_v0 }
  0x58   :  { %497 = vmatpush3.bf16.msra.mxu0 %v563_v5  ;;  %517 = vmatpush3.bf16.msra.mxu1 %v571_v10 }
  0x59   :  { %498 = vmatprep.subr.bf16.mxu0 %v686_v0  ;;  %518 = vmatprep.subr.bf16.mxu1 %v686_v0 }
  0x5c   :  { %499 = vmatpush3.bf16.msra.mxu0 %v564_v7  ;;  %519 = vmatpush3.bf16.msra.mxu1 %v572_v12 }
  0x5d   :  { %500 = vmatprep.subr.bf16.mxu0 %v686_v0  ;;  %520 = vmatprep.subr.bf16.mxu1 %v686_v0 }
  0x60   :  { %501 = vmatpush3.bf16.msra.mxu0 %v565_v9  ;;  %521 = vmatpush3.bf16.msra.mxu1 %v573_v16 }
  0x61   :  { %502 = vmatprep.subr.bf16.mxu0 %v686_v0  ;;  %522 = vmatprep.subr.bf16.mxu1 %v686_v0 }
  0x64   :  { %503 = vmatpush3.bf16.msra.mxu0 %v566_v11  ;;  %523 = vmatpush3.bf16.msra.mxu1 %v574_v18 }
  0x65   :  { %504 = vmatprep.subr.bf16.mxu0 %v686_v0  ;;  %524 = vmatprep.subr.bf16.mxu1 %v686_v0 }
  0x68   :  { %505 = vmatpush3.bf16.msra.mxu0 %v567_v13  ;;  %525 = vmatpush3.bf16.msra.mxu1 %v575_v19 }
  0x69   :  { %530 = vmatprep.subr.bf16.mxu0 %v686_v0 }
  0x6b   :  { %507 = vmatmul.mubr.bf16.vlgmr.msra.gmra.mrb[0].mxu0 %v84_v17 }
  0x6c   :  { %546 = vmatprep.mubr.msk.bf16.mxu0 %vm687_vm0, %v686_v0  ;;  %531 = vmatpush3.bf16.msra.mxu0 %v576_v20 }
  0x6d   :  { %532 = vmatprep.subr.bf16.mxu0 %v686_v0 }
  0x70   :  { %533 = vmatpush3.bf16.msra.mxu0 %v577_v21 }
  0x71   :  { %534 = vmatprep.subr.bf16.mxu0 %v686_v0 }
  0x74   :  { %535 = vmatpush3.bf16.msra.mxu0 %v578_v22 }
  0x75   :  { %536 = vmatprep.subr.bf16.mxu0 %v686_v0 }
  0x78   :  { %537 = vmatpush3.bf16.msra.mxu0 %v579_v23 }
  0x79   :  { %538 = vmatprep.subr.bf16.mxu0 %v686_v0 }
  0x7c   :  { %539 = vmatpush3.bf16.msra.mxu0 %v580_v24 }
  0x7d   :  { %540 = vmatprep.subr.bf16.mxu0 %v686_v0 }
  0x80   :  { %541 = vmatpush3.bf16.msra.mxu0 %v581_v25 }
  0x81   :  { %542 = vmatprep.subr.bf16.mxu0 %v686_v0 }
  0x84   :  { %543 = vmatpush3.bf16.msra.mxu0 %v582_v36 }
  0x85   :  { %544 = vmatprep.subr.bf16.mxu0 %v686_v0 }
  0x88   :  { %545 = vmatpush3.bf16.msra.mxu0 %v583_v37 }
 0x13e   :  { %v190_v27 = vpop.f32.mrb[0].mxu0 }
 0x13f   :  { %v191_v28 = vadd.f32 %v436_v26, %v190_v27  ;;  %v508_v29 = vpop.f32.mrb[1].mxu0 }
 0x140   :  { %v193_v30 = vpop.f32.mrb[2].mxu0 }
 0x141   :  { %v194_v31 = vadd.f32 %v436_v26, %v193_v30  ;;  %v509_v32 = vpop.f32.mrb[3].mxu0  ;;  %v197_v33 = vmax.f32 %v191_v28, 0.0 }
 0x143   :  { %v198_v34 = vmax.f32 %v194_v31, 0.0 }
 0x145   :  { %v199_v35 = vpack.c.bf16 %v198_v34, %v197_v33 }
 0x147   :  { %527 = vmatmul.mubr.bf16.vlgmr.msra.gmra.mrb[0].mxu1 %v199_v35 }
 0x21a   :  { %v305_v39 = vpop.f32.mrb[0].mxu1 }
 0x21b   :  { %v306_v40 = vadd.f32 %v445_v38, %v305_v39  ;;  %v528_v41 = vpop.f32.mrb[1].mxu1 }
 0x21c   :  { %v308_v42 = vpop.f32.mrb[2].mxu1 }
 0x21d   :  { %v309_v43 = vadd.f32 %v445_v38, %v308_v42  ;;  %v529_v44 = vpop.f32.mrb[3].mxu1  ;;  %v312_v45 = vmax.f32 %v306_v40, 0.0 }
 0x21f   :  { %v313_v46 = vmax.f32 %v309_v43, 0.0 }
 0x221   :  { %v314_v47 = vpack.c.bf16 %v313_v46, %v312_v45 }
 0x223   :  { %547 = vmatmul.mubr.bf16.vlgmr.msra.gmra.mrb[4].mxu0 %v314_v47 }
 0x2f6   :  { %v420_v49 = vpop.f32.mrb[4].mxu0 }
 0x2f7   :  { %v421_v50 = vadd.f32 %v454_v48, %v420_v49  ;;  %v548_v51 = vpop.f32.mrb[5].mxu0 }
 0x2f8   :  { %v423_v52 = vpop.f32.mrb[6].mxu0 }
 0x2f9   :  { %427 = vst [vmem:[%s844_s7] sm:$0xff] %v421_v50  ;;  %v424_v53 = vadd.f32 %v454_v48, %v423_v52  ;;  %v549_v54 = vpop.f32.mrb[7].mxu0 }
 0x2fb   :  { %428 = vst [vmem:[%s844_s7 + $0x8] sm:$0xff] %v424_v53 }
 0x2fc   :  { %433 = vsyncpa [#allocation3], 1 }
 0x2fd   :  { %434 = vsyncpa [#allocation5], 1 }
 0x2fe   :  { %435 = vsyncpa [#allocation8], 1 }

</bundles_post_ra>
